<compile_context>
chip_gen: v6e
topology: v6e:2x2x1
jax: 0.10.0
libtpu: 0.0.40
codegen_flags: <defaults>
</compile_context>

<pallas_src>
import functools
import math

import jax
import jax.numpy as jnp
from jax import lax
from jax.experimental import pallas as pl
from jax.experimental.pallas import tpu as pltpu

_LANE = 128      # lane count (last-dim tiling)
_SUBLANE = 8     # sublane count (second-to-last-dim tiling)


def _round_up(x, m):
    return (x + m - 1) // m * m


def _lstm_recurrence_kernel(gx_ref, whh_ref, out_ref, h_scr, c_scr):
    """Serial LSTM recurrence over one time slab.

    gx_ref : (T_BLK, B_pad, 4*H_pad) f32  precomputed x @ W_ih^T (gate order i,f,g,o,
                                          each gate padded to a lane-aligned H_pad block)
    whh_ref: (H_pad, 4*H_pad)        bf16 recurrent weight (transposed, gate-blocked)
    out_ref: (T_BLK, B_pad, H_pad)   f32  hidden states for this slab
    h_scr  : (B_pad, H_pad)          f32  hidden state carry (persists across grid steps)
    c_scr  : (B_pad, H_pad)          f32  cell state carry   (persists across grid steps)
    """
    t_blk = gx_ref.shape[0]
    h_pad = out_ref.shape[-1]

    @pl.when(pl.program_id(0) == 0)
    def _():
        h_scr[...] = jnp.zeros_like(h_scr)
        c_scr[...] = jnp.zeros_like(c_scr)

    def step(t, carry):
        h, c = carry
        gx_t = gx_ref[pl.ds(t, 1), :, :][0]                    # (B_pad, 4*H_pad), lane-dense
        # Recurrent matmul: bf16 operands, f32 accumulation on the MXU.  W_hh stays in
        # VMEM (not force-hoisted into vregs) so large H does not spill.
        gates = gx_t + jnp.dot(h.astype(jnp.bfloat16), whh_ref[...],
                               preferred_element_type=jnp.float32)
        # Each gate is a lane-aligned 128-wide block -> whole-vreg slices.
        i_g = jax.nn.sigmoid(gates[:, 0 * h_pad:1 * h_pad])
        f_g = jax.nn.sigmoid(gates[:, 1 * h_pad:2 * h_pad])
        g_g = jnp.tanh(gates[:, 2 * h_pad:3 * h_pad])
        o_g = jax.nn.sigmoid(gates[:, 3 * h_pad:4 * h_pad])
        c_new = f_g * c + i_g * g_g
        h_new = o_g * jnp.tanh(c_new)
        out_ref[pl.ds(t, 1), :, :] = h_new[None, :, :]         # contiguous (B_pad, H_pad) store
        return h_new, c_new

    # Small static trip count -> unroll for cross-iteration scheduler visibility
    # (overlap the t+1 weight push / gx load with the t-step EUP/VPU tail).
    h, c = lax.fori_loop(0, t_blk, step, (h_scr[...], c_scr[...]),
                         unroll=min(t_blk, 8))
    h_scr[...] = h
    c_scr[...] = c


def lstm_block_forward(x, w_ih, w_hh, *, t_blk=128):
    """x: (B, T, I) f32; w_ih: (4H, I); w_hh: (4H, H)  (PyTorch layout, gate order i,f,g,o).

    Returns (B, T, H) f32, matching nn.LSTM(batch_first=True, bias=False) output.
    """
    B, T, I = x.shape
    H = w_hh.shape[1]

    h_pad = _round_up(H, _LANE)
    b_pad = _round_up(max(B, _SUBLANE), _SUBLANE)
    t_blk = min(t_blk, T)
    t_pad = _round_up(T, t_blk)

    # --- Weight re-layout: (4H, *) -> (*, 4*H_pad), each gate in its own lane-aligned
    #     H_pad-wide column block (zero padded).  Padded columns produce g=tanh(0)=0 and
    #     c starts at 0, so padded hidden lanes stay exactly 0.
    w_ih_g = jnp.pad(w_ih.reshape(4, H, I), ((0, 0), (0, h_pad - H), (0, 0)))
    w_ih_t = jnp.transpose(w_ih_g, (2, 0, 1)).reshape(I, 4 * h_pad)
    w_hh_g = jnp.pad(w_hh.reshape(4, H, H), ((0, 0), (0, h_pad - H), (0, h_pad - H)))
    w_hh_t = jnp.transpose(w_hh_g, (2, 0, 1)).reshape(h_pad, 4 * h_pad).astype(jnp.bfloat16)

    # --- Hoisted input projection: one large bf16 MXU matmul, f32 accumulation.
    gates_x = jnp.dot(x.reshape(B * T, I).astype(jnp.bfloat16),
                      w_ih_t.astype(jnp.bfloat16),
                      preferred_element_type=jnp.float32).reshape(B, T, 4 * h_pad)

    # --- Pad batch/time and go time-major so each per-step slab is contiguous.
    gates_x = jnp.pad(gates_x, ((0, b_pad - B), (0, t_pad - T), (0, 0)))
    gates_x = jnp.transpose(gates_x, (1, 0, 2))               # (T_pad, B_pad, 4*H_pad)

    grid = (t_pad // t_blk,)
    y = pl.pallas_call(
        _lstm_recurrence_kernel,
        out_shape=jax.ShapeDtypeStruct((t_pad, b_pad, h_pad), jnp.float32),
        grid_spec=pltpu.PrefetchScalarGridSpec(
            num_scalar_prefetch=0,
            grid=grid,
            in_specs=[
                pl.BlockSpec((t_blk, b_pad, 4 * h_pad), lambda i: (i, 0, 0)),
                pl.BlockSpec((h_pad, 4 * h_pad), lambda i: (0, 0)),
            ],
            out_specs=pl.BlockSpec((t_blk, b_pad, h_pad), lambda i: (i, 0, 0)),
            scratch_shapes=[
                pltpu.VMEM((b_pad, h_pad), jnp.float32),      # h carry
                pltpu.VMEM((b_pad, h_pad), jnp.float32),      # c carry
            ],
        ),
        compiler_params=pltpu.CompilerParams(
            # The time axis is a serial recurrence -> keep it "arbitrary".
            dimension_semantics=("arbitrary",),
        ),
    )(gates_x, w_hh_t)

    # (T_pad, B_pad, H_pad) -> (B, T, H)   (layout plumbing only)
    return jnp.transpose(y, (1, 0, 2))[:B, :T, :H]


def lstm_block_reference(x, w_ih, w_hh):
    """Pure-JAX f32 reference (PyTorch nn.LSTM semantics, bias=False, 1 layer)."""
    B, T, I = x.shape
    H = w_hh.shape[1]

    def step(carry, x_t):
        h, c = carry
        gates = x_t @ w_ih.T + h @ w_hh.T
        i_g = jax.nn.sigmoid(gates[:, 0 * H:1 * H])
        f_g = jax.nn.sigmoid(gates[:, 1 * H:2 * H])
        g_g = jnp.tanh(gates[:, 2 * H:3 * H])
        o_g = jax.nn.sigmoid(gates[:, 3 * H:4 * H])
        c_new = f_g * c + i_g * g_g
        h_new = o_g * jnp.tanh(c_new)
        return (h_new, c_new), h_new

    h0 = jnp.zeros((B, H), jnp.float32)
    c0 = jnp.zeros((B, H), jnp.float32)
    _, hs = lax.scan(step, (h0, c0), jnp.swapaxes(x, 0, 1))   # (T, B, H)
    return jnp.swapaxes(hs, 0, 1)


if __name__ == "__main__":
    # Shapes implied by LSTMBlock(in_channels=4, out_channels=32) on a (B, T, C_in) sequence.
    B, T, IN_CH, OUT_CH = 2, 8, 4, 32

    key = jax.random.PRNGKey(0)
    kx, kih, khh = jax.random.split(key, 3)

    x = jax.random.normal(kx, (B, T, IN_CH), dtype=jnp.float32)

    # PyTorch default LSTM init: U(-1/sqrt(H), 1/sqrt(H)); gate order (i, f, g, o).
    bound = 1.0 / math.sqrt(OUT_CH)
    w_ih = jax.random.uniform(kih, (4 * OUT_CH, IN_CH), jnp.float32, -bound, bound)
    w_hh = jax.random.uniform(khh, (4 * OUT_CH, OUT_CH), jnp.float32, -bound, bound)

    # t_blk=4 -> 2 time slabs, exercising the h/c scratch carry across grid steps.
    fwd = jax.jit(functools.partial(lstm_block_forward, t_blk=4))
    out = jax.block_until_ready(fwd(x, w_ih, w_hh))

    ref = jax.block_until_ready(lstm_block_reference(x, w_ih, w_hh))
    assert out.shape == (B, T, OUT_CH)
    # bf16 matmul operands (f32 accumulation) -> looser tolerance vs the f32 reference,
    # since rounding compounds over the T-step recurrence.
    max_err = jnp.max(jnp.abs(out - ref))
    assert jnp.allclose(out, ref, atol=2e-2, rtol=2e-2), f"mismatch vs reference (max abs err={max_err})"

    print("KERNEL_OK")
</pallas_src>

<mosaic_0001>
module attributes {stable_mosaic.version = 11 : i64} {
  func.func @_lstm_recurrence_kernel(%arg0: i32, %arg1: memref<4x8x512xf32, #tpu.memory_space<vmem>>, %arg2: memref<128x512xbf16, #tpu.memory_space<vmem>>, %arg3: memref<4x8x128xf32, #tpu.memory_space<vmem>>, %arg4: memref<8x128xf32, #tpu.memory_space<vmem>>, %arg5: memref<8x128xf32, #tpu.memory_space<vmem>>) attributes {dimension_semantics = [#tpu.dimension_semantics<arbitrary>], iteration_bounds = array<i64: 2>, scalar_prefetch = 0 : i64, scratch_operands = 2 : i64, tpu.core_type = #tpu.core_type<tc>, window_params = [{transform_indices = @transform_0, window_bounds = array<i64: 4, 8, 512>}, {pipeline_mode = #tpu.pipeline_mode<synchronous>, transform_indices = @transform_1, window_bounds = array<i64: 128, 512>}, {transform_indices = @transform_2, window_bounds = array<i64: 4, 8, 128>}]} {
    %c0_i32 = arith.constant 0 : i32
    %0 = arith.cmpi eq, %arg0, %c0_i32 : i32
    %1 = arith.extui %0 : i1 to i32
    %c0_i32_0 = arith.constant 0 : i32
    %2 = arith.cmpi ne, %1, %c0_i32_0 : i32
    scf.if %2 {
      %cst_48 = arith.constant 0.000000e+00 : f32
      %147 = vector.broadcast %cst_48 : f32 to vector<8x128xf32>
      %c0_49 = arith.constant 0 : index
      %c0_50 = arith.constant 0 : index
      %148 = vector.load %arg4[%c0_49, %c0_50] : memref<8x128xf32, #tpu.memory_space<vmem>>, vector<8x128xf32>
      tpu.vector_store %arg4[%c0_49, %c0_50], %147 {strides = array<i32>} : memref<8x128xf32, #tpu.memory_space<vmem>>, vector<8x128xf32>,
      %cst_51 = arith.constant 0.000000e+00 : f32
      %149 = vector.broadcast %cst_51 : f32 to vector<8x128xf32>
      %c0_52 = arith.constant 0 : index
      %c0_53 = arith.constant 0 : index
      %150 = vector.load %arg5[%c0_52, %c0_53] : memref<8x128xf32, #tpu.memory_space<vmem>>, vector<8x128xf32>
      tpu.vector_store %arg5[%c0_52, %c0_53], %149 {strides = array<i32>} : memref<8x128xf32, #tpu.memory_space<vmem>>, vector<8x128xf32>,
    } else {
    }
    %c0 = arith.constant 0 : index
    %c0_1 = arith.constant 0 : index
    %3 = vector.load %arg4[%c0, %c0_1] : memref<8x128xf32, #tpu.memory_space<vmem>>, vector<8x128xf32>
    %c0_2 = arith.constant 0 : index
    %c0_3 = arith.constant 0 : index
    %4 = vector.load %arg5[%c0_2, %c0_3] : memref<8x128xf32, #tpu.memory_space<vmem>>, vector<8x128xf32>
    %c0_i32_4 = arith.constant 0 : i32
    %5 = arith.index_cast %c0_i32_4 : i32 to index
    %c0_5 = arith.constant 0 : index
    %c0_6 = arith.constant 0 : index
    %6 = vector.load %arg1[%5, %c0_5, %c0_6] : memref<4x8x512xf32, #tpu.memory_space<vmem>>, vector<1x8x512xf32>
    %7 = vector.shape_cast %6 : vector<1x8x512xf32> to vector<8x512xf32>
    %8 = arith.truncf %3 : vector<8x128xf32> to vector<8x128xbf16>
    %c0_7 = arith.constant 0 : index
    %c0_8 = arith.constant 0 : index
    %9 = vector.load %arg2[%c0_7, %c0_8] : memref<128x512xbf16, #tpu.memory_space<vmem>>, vector<128x512xbf16>
    %cst = arith.constant dense<0.000000e+00> : vector<8x512xf32>
    %10 = tpu.matmul %8, %9, %cst {dimension_numbers = #tpu.dot_dimension_numbers<[1], [0], [0], [1], [0, 0, 1, 1], [], []>} : vector<8x128xbf16>, vector<128x512xbf16>, vector<8x512xf32> -> vector<8x512xf32>
    %11 = arith.addf %7, %10 : vector<8x512xf32>
    %12 = vector.extract_strided_slice %11 {offsets = [0, 0], sizes = [8, 128], strides = [1, 1]} : vector<8x512xf32> to vector<8x128xf32>
    %13 = arith.negf %12 : vector<8x128xf32>
    %14 = math.exp %13 : vector<8x128xf32>
    %cst_9 = arith.constant 1.000000e+00 : f32
    %15 = vector.broadcast %cst_9 : f32 to vector<8x128xf32>
    %16 = arith.addf %15, %14 : vector<8x128xf32>
    %17 = arith.divf %15, %16 : vector<8x128xf32>
    %18 = vector.extract_strided_slice %11 {offsets = [0, 128], sizes = [8, 128], strides = [1, 1]} : vector<8x512xf32> to vector<8x128xf32>
    %19 = arith.negf %18 : vector<8x128xf32>
    %20 = math.exp %19 : vector<8x128xf32>
    %cst_10 = arith.constant 1.000000e+00 : f32
    %21 = vector.broadcast %cst_10 : f32 to vector<8x128xf32>
    %22 = arith.addf %21, %20 : vector<8x128xf32>
    %23 = arith.divf %21, %22 : vector<8x128xf32>
    %24 = vector.extract_strided_slice %11 {offsets = [0, 256], sizes = [8, 128], strides = [1, 1]} : vector<8x512xf32> to vector<8x128xf32>
    %25 = math.tanh %24 : vector<8x128xf32>
    %26 = vector.extract_strided_slice %11 {offsets = [0, 384], sizes = [8, 128], strides = [1, 1]} : vector<8x512xf32> to vector<8x128xf32>
    %27 = arith.negf %26 : vector<8x128xf32>
    %28 = math.exp %27 : vector<8x128xf32>
    %cst_11 = arith.constant 1.000000e+00 : f32
    %29 = vector.broadcast %cst_11 : f32 to vector<8x128xf32>
    %30 = arith.addf %29, %28 : vector<8x128xf32>
    %31 = arith.divf %29, %30 : vector<8x128xf32>
    %32 = arith.mulf %23, %4 : vector<8x128xf32>
    %33 = arith.mulf %17, %25 : vector<8x128xf32>
    %34 = arith.addf %32, %33 : vector<8x128xf32>
    %35 = math.tanh %34 : vector<8x128xf32>
    %36 = arith.mulf %31, %35 : vector<8x128xf32>
    %37 = vector.shape_cast %36 : vector<8x128xf32> to vector<1x8x128xf32>
    %38 = arith.index_cast %c0_i32_4 : i32 to index
    %c0_12 = arith.constant 0 : index
    %c0_13 = arith.constant 0 : index
    %39 = vector.load %arg3[%38, %c0_12, %c0_13] : memref<4x8x128xf32, #tpu.memory_space<vmem>>, vector<1x8x128xf32>
    tpu.vector_store %arg3[%38, %c0_12, %c0_13], %37 {strides = array<i32>} : memref<4x8x128xf32, #tpu.memory_space<vmem>>, vector<1x8x128xf32>,
    %c1_i32 = arith.constant 1 : i32
    %40 = arith.index_cast %c1_i32 : i32 to index
    %c0_14 = arith.constant 0 : index
    %c0_15 = arith.constant 0 : index
    %41 = vector.load %arg1[%40, %c0_14, %c0_15] : memref<4x8x512xf32, #tpu.memory_space<vmem>>, vector<1x8x512xf32>
    %42 = vector.shape_cast %41 : vector<1x8x512xf32> to vector<8x512xf32>
    %43 = arith.truncf %36 : vector<8x128xf32> to vector<8x128xbf16>
    %c0_16 = arith.constant 0 : index
    %c0_17 = arith.constant 0 : index
    %44 = vector.load %arg2[%c0_16, %c0_17] : memref<128x512xbf16, #tpu.memory_space<vmem>>, vector<128x512xbf16>
    %cst_18 = arith.constant dense<0.000000e+00> : vector<8x512xf32>
    %45 = tpu.matmul %43, %44, %cst_18 {dimension_numbers = #tpu.dot_dimension_numbers<[1], [0], [0], [1], [0, 0, 1, 1], [], []>} : vector<8x128xbf16>, vector<128x512xbf16>, vector<8x512xf32> -> vector<8x512xf32>
    %46 = arith.addf %42, %45 : vector<8x512xf32>
    %47 = vector.extract_strided_slice %46 {offsets = [0, 0], sizes = [8, 128], strides = [1, 1]} : vector<8x512xf32> to vector<8x128xf32>
    %48 = arith.negf %47 : vector<8x128xf32>
    %49 = math.exp %48 : vector<8x128xf32>
    %cst_19 = arith.constant 1.000000e+00 : f32
    %50 = vector.broadcast %cst_19 : f32 to vector<8x128xf32>
    %51 = arith.addf %50, %49 : vector<8x128xf32>
    %52 = arith.divf %50, %51 : vector<8x128xf32>
    %53 = vector.extract_strided_slice %46 {offsets = [0, 128], sizes = [8, 128], strides = [1, 1]} : vector<8x512xf32> to vector<8x128xf32>
    %54 = arith.negf %53 : vector<8x128xf32>
    %55 = math.exp %54 : vector<8x128xf32>
    %cst_20 = arith.constant 1.000000e+00 : f32
    %56 = vector.broadcast %cst_20 : f32 to vector<8x128xf32>
    %57 = arith.addf %56, %55 : vector<8x128xf32>
    %58 = arith.divf %56, %57 : vector<8x128xf32>
    %59 = vector.extract_strided_slice %46 {offsets = [0, 256], sizes = [8, 128], strides = [1, 1]} : vector<8x512xf32> to vector<8x128xf32>
    %60 = math.tanh %59 : vector<8x128xf32>
    %61 = vector.extract_strided_slice %46 {offsets = [0, 384], sizes = [8, 128], strides = [1, 1]} : vector<8x512xf32> to vector<8x128xf32>
    %62 = arith.negf %61 : vector<8x128xf32>
    %63 = math.exp %62 : vector<8x128xf32>
    %cst_21 = arith.constant 1.000000e+00 : f32
    %64 = vector.broadcast %cst_21 : f32 to vector<8x128xf32>
    %65 = arith.addf %64, %63 : vector<8x128xf32>
    %66 = arith.divf %64, %65 : vector<8x128xf32>
    %67 = arith.mulf %58, %34 : vector<8x128xf32>
    %68 = arith.mulf %52, %60 : vector<8x128xf32>
    %69 = arith.addf %67, %68 : vector<8x128xf32>
    %70 = math.tanh %69 : vector<8x128xf32>
    %71 = arith.mulf %66, %70 : vector<8x128xf32>
    %72 = vector.shape_cast %71 : vector<8x128xf32> to vector<1x8x128xf32>
    %73 = arith.index_cast %c1_i32 : i32 to index
    %c0_22 = arith.constant 0 : index
    %c0_23 = arith.constant 0 : index
    %74 = vector.load %arg3[%73, %c0_22, %c0_23] : memref<4x8x128xf32, #tpu.memory_space<vmem>>, vector<1x8x128xf32>
    tpu.vector_store %arg3[%73, %c0_22, %c0_23], %72 {strides = array<i32>} : memref<4x8x128xf32, #tpu.memory_space<vmem>>, vector<1x8x128xf32>,
    %c2_i32 = arith.constant 2 : i32
    %75 = arith.index_cast %c2_i32 : i32 to index
    %c0_24 = arith.constant 0 : index
    %c0_25 = arith.constant 0 : index
    %76 = vector.load %arg1[%75, %c0_24, %c0_25] : memref<4x8x512xf32, #tpu.memory_space<vmem>>, vector<1x8x512xf32>
    %77 = vector.shape_cast %76 : vector<1x8x512xf32> to vector<8x512xf32>
    %78 = arith.truncf %71 : vector<8x128xf32> to vector<8x128xbf16>
    %c0_26 = arith.constant 0 : index
    %c0_27 = arith.constant 0 : index
    %79 = vector.load %arg2[%c0_26, %c0_27] : memref<128x512xbf16, #tpu.memory_space<vmem>>, vector<128x512xbf16>
    %cst_28 = arith.constant dense<0.000000e+00> : vector<8x512xf32>
    %80 = tpu.matmul %78, %79, %cst_28 {dimension_numbers = #tpu.dot_dimension_numbers<[1], [0], [0], [1], [0, 0, 1, 1], [], []>} : vector<8x128xbf16>, vector<128x512xbf16>, vector<8x512xf32> -> vector<8x512xf32>
    %81 = arith.addf %77, %80 : vector<8x512xf32>
    %82 = vector.extract_strided_slice %81 {offsets = [0, 0], sizes = [8, 128], strides = [1, 1]} : vector<8x512xf32> to vector<8x128xf32>
    %83 = arith.negf %82 : vector<8x128xf32>
    %84 = math.exp %83 : vector<8x128xf32>
    %cst_29 = arith.constant 1.000000e+00 : f32
    %85 = vector.broadcast %cst_29 : f32 to vector<8x128xf32>
    %86 = arith.addf %85, %84 : vector<8x128xf32>
    %87 = arith.divf %85, %86 : vector<8x128xf32>
    %88 = vector.extract_strided_slice %81 {offsets = [0, 128], sizes = [8, 128], strides = [1, 1]} : vector<8x512xf32> to vector<8x128xf32>
    %89 = arith.negf %88 : vector<8x128xf32>
    %90 = math.exp %89 : vector<8x128xf32>
    %cst_30 = arith.constant 1.000000e+00 : f32
    %91 = vector.broadcast %cst_30 : f32 to vector<8x128xf32>
    %92 = arith.addf %91, %90 : vector<8x128xf32>
    %93 = arith.divf %91, %92 : vector<8x128xf32>
    %94 = vector.extract_strided_slice %81 {offsets = [0, 256], sizes = [8, 128], strides = [1, 1]} : vector<8x512xf32> to vector<8x128xf32>
    %95 = math.tanh %94 : vector<8x128xf32>
    %96 = vector.extract_strided_slice %81 {offsets = [0, 384], sizes = [8, 128], strides = [1, 1]} : vector<8x512xf32> to vector<8x128xf32>
    %97 = arith.negf %96 : vector<8x128xf32>
    %98 = math.exp %97 : vector<8x128xf32>
    %cst_31 = arith.constant 1.000000e+00 : f32
    %99 = vector.broadcast %cst_31 : f32 to vector<8x128xf32>
    %100 = arith.addf %99, %98 : vector<8x128xf32>
    %101 = arith.divf %99, %100 : vector<8x128xf32>
    %102 = arith.mulf %93, %69 : vector<8x128xf32>
    %103 = arith.mulf %87, %95 : vector<8x128xf32>
    %104 = arith.addf %102, %103 : vector<8x128xf32>
    %105 = math.tanh %104 : vector<8x128xf32>
    %106 = arith.mulf %101, %105 : vector<8x128xf32>
    %107 = vector.shape_cast %106 : vector<8x128xf32> to vector<1x8x128xf32>
    %108 = arith.index_cast %c2_i32 : i32 to index
    %c0_32 = arith.constant 0 : index
    %c0_33 = arith.constant 0 : index
    %109 = vector.load %arg3[%108, %c0_32, %c0_33] : memref<4x8x128xf32, #tpu.memory_space<vmem>>, vector<1x8x128xf32>
    tpu.vector_store %arg3[%108, %c0_32, %c0_33], %107 {strides = array<i32>} : memref<4x8x128xf32, #tpu.memory_space<vmem>>, vector<1x8x128xf32>,
    %c3_i32 = arith.constant 3 : i32
    %110 = arith.index_cast %c3_i32 : i32 to index
    %c0_34 = arith.constant 0 : index
    %c0_35 = arith.constant 0 : index
    %111 = vector.load %arg1[%110, %c0_34, %c0_35] : memref<4x8x512xf32, #tpu.memory_space<vmem>>, vector<1x8x512xf32>
    %112 = vector.shape_cast %111 : vector<1x8x512xf32> to vector<8x512xf32>
    %113 = arith.truncf %106 : vector<8x128xf32> to vector<8x128xbf16>
    %c0_36 = arith.constant 0 : index
    %c0_37 = arith.constant 0 : index
    %114 = vector.load %arg2[%c0_36, %c0_37] : memref<128x512xbf16, #tpu.memory_space<vmem>>, vector<128x512xbf16>
    %cst_38 = arith.constant dense<0.000000e+00> : vector<8x512xf32>
    %115 = tpu.matmul %113, %114, %cst_38 {dimension_numbers = #tpu.dot_dimension_numbers<[1], [0], [0], [1], [0, 0, 1, 1], [], []>} : vector<8x128xbf16>, vector<128x512xbf16>, vector<8x512xf32> -> vector<8x512xf32>
    %116 = arith.addf %112, %115 : vector<8x512xf32>
    %117 = vector.extract_strided_slice %116 {offsets = [0, 0], sizes = [8, 128], strides = [1, 1]} : vector<8x512xf32> to vector<8x128xf32>
    %118 = arith.negf %117 : vector<8x128xf32>
    %119 = math.exp %118 : vector<8x128xf32>
    %cst_39 = arith.constant 1.000000e+00 : f32
    %120 = vector.broadcast %cst_39 : f32 to vector<8x128xf32>
    %121 = arith.addf %120, %119 : vector<8x128xf32>
    %122 = arith.divf %120, %121 : vector<8x128xf32>
    %123 = vector.extract_strided_slice %116 {offsets = [0, 128], sizes = [8, 128], strides = [1, 1]} : vector<8x512xf32> to vector<8x128xf32>
    %124 = arith.negf %123 : vector<8x128xf32>
    %125 = math.exp %124 : vector<8x128xf32>
    %cst_40 = arith.constant 1.000000e+00 : f32
    %126 = vector.broadcast %cst_40 : f32 to vector<8x128xf32>
    %127 = arith.addf %126, %125 : vector<8x128xf32>
    %128 = arith.divf %126, %127 : vector<8x128xf32>
    %129 = vector.extract_strided_slice %116 {offsets = [0, 256], sizes = [8, 128], strides = [1, 1]} : vector<8x512xf32> to vector<8x128xf32>
    %130 = math.tanh %129 : vector<8x128xf32>
    %131 = vector.extract_strided_slice %116 {offsets = [0, 384], sizes = [8, 128], strides = [1, 1]} : vector<8x512xf32> to vector<8x128xf32>
    %132 = arith.negf %131 : vector<8x128xf32>
    %133 = math.exp %132 : vector<8x128xf32>
    %cst_41 = arith.constant 1.000000e+00 : f32
    %134 = vector.broadcast %cst_41 : f32 to vector<8x128xf32>
    %135 = arith.addf %134, %133 : vector<8x128xf32>
    %136 = arith.divf %134, %135 : vector<8x128xf32>
    %137 = arith.mulf %128, %104 : vector<8x128xf32>
    %138 = arith.mulf %122, %130 : vector<8x128xf32>
    %139 = arith.addf %137, %138 : vector<8x128xf32>
    %140 = math.tanh %139 : vector<8x128xf32>
    %141 = arith.mulf %136, %140 : vector<8x128xf32>
    %142 = vector.shape_cast %141 : vector<8x128xf32> to vector<1x8x128xf32>
    %143 = arith.index_cast %c3_i32 : i32 to index
    %c0_42 = arith.constant 0 : index
    %c0_43 = arith.constant 0 : index
    %144 = vector.load %arg3[%143, %c0_42, %c0_43] : memref<4x8x128xf32, #tpu.memory_space<vmem>>, vector<1x8x128xf32>
    tpu.vector_store %arg3[%143, %c0_42, %c0_43], %142 {strides = array<i32>} : memref<4x8x128xf32, #tpu.memory_space<vmem>>, vector<1x8x128xf32>,
    %c4_i32 = arith.constant 4 : i32
    %c0_44 = arith.constant 0 : index
    %c0_45 = arith.constant 0 : index
    %145 = vector.load %arg4[%c0_44, %c0_45] : memref<8x128xf32, #tpu.memory_space<vmem>>, vector<8x128xf32>
    tpu.vector_store %arg4[%c0_44, %c0_45], %141 {strides = array<i32>} : memref<8x128xf32, #tpu.memory_space<vmem>>, vector<8x128xf32>,
    %c0_46 = arith.constant 0 : index
    %c0_47 = arith.constant 0 : index
    %146 = vector.load %arg5[%c0_46, %c0_47] : memref<8x128xf32, #tpu.memory_space<vmem>>, vector<8x128xf32>
    tpu.vector_store %arg5[%c0_46, %c0_47], %139 {strides = array<i32>} : memref<8x128xf32, #tpu.memory_space<vmem>>, vector<8x128xf32>,
    return
  }
  func.func @transform_0(%arg0: i32) -> (i32, i32, i32) {
    %c0_i32 = arith.constant 0 : i32
    %c0_i32_0 = arith.constant 0 : i32
    %c0_i32_1 = arith.constant 0 : i32
    return %arg0, %c0_i32, %c0_i32_0 : i32, i32, i32
  }
  func.func @transform_1(%arg0: i32) -> (i32, i32) {
    %c0_i32 = arith.constant 0 : i32
    %c0_i32_0 = arith.constant 0 : i32
    %c0_i32_1 = arith.constant 0 : i32
    return %c0_i32, %c0_i32_0 : i32, i32
  }
  func.func @transform_2(%arg0: i32) -> (i32, i32, i32) {
    %c0_i32 = arith.constant 0 : i32
    %c0_i32_0 = arith.constant 0 : i32
    %c0_i32_1 = arith.constant 0 : i32
    return %arg0, %c0_i32, %c0_i32_0 : i32, i32, i32
  }
}

</mosaic_0001>

<bundles_post_ra>
// kernel: lstm_block_forward.1
= control target key start
LH: loop header
LB: loop body
LE: loop exit
PB: predicated region body
PF: predicated region fallthrough
CT: control target
= control target key end

     0   :  { %s1771_s9 = smov 0   ;;  %s2116_s0 = inlined_call_operand.vmem [shape: f32[8,8,512], index: 0, kind: input, shape index: {}]   ;;  %s2117_s1 = inlined_call_operand.vmem [shape: bf16[128,512], index: 1, kind: input, shape index: {}]   ;;  %s2118_s2 = inlined_call_operand.vmem [shape: f32[8,8,128], index: 2, kind: output, shape index: {}]  }
   0x1 LB: > { %s1455_s10 = sadd.s32 4294967295, %s1752_s9   ;;  %p1459_p0 = scmp.ge.s32.totalorder %s1752_s9, 1  ;;  %s1752_s9 = sphi %s1771_s9, %s12_s9  }
   0x2   : > { %p114_p1 = scmp.lt.s32.totalorder %s1752_s9, 3 }
   0x4   : > { %p115_p2 = pnand %p1459_p0, %p114_p1 }
   0x5   : > { %s1460_s11 = sshll.u32 (!%p115_p2), %s1455_s10, 2  ;;  %p1465_p4 = scmp.ne.s32.totalorder (!%p115_p2), %s1455_s10, 0 }
   0x6   : > { %118 = sbr.rel (%p115_p2) target bundleno = 1055 (0x41f), region = 28  ;;  %p138_p3 = scmp.lt.s32.totalorder (!%p115_p2), %s1460_s11, 7 }
   0xb   : > { %s2120_s11 = smov (!%p138_p3, %s1460_s11), 7  ;;  %154 = sbr.rel (%p1465_p4) target bundleno = 18 (0x12), region = 32 }
   0xc   : > { %s1623_s12 = sshll.u32 %s2120_s11, 5  ;;  %s1464_s13 = sshll.u32 %s2120_s11, 3 }
   0xd   : > { %s1782_s16 = scalar_lea.vmem %s2116_s0, %s1623_s12  ;;  %s1787_s19 = scalar_lea.vmem %s2118_s2, %s1464_s13 }
  0x10   : > { %v1754_v0 = vmov 0.0  }
  0x11   : > { %155 = vst [vmem:[#allocation2] sm:$0xff] %v1754_v0  ;;  %156 = vst [vmem:[#allocation3] sm:$0xff] %v1754_v0 }
  0x12 PF: > { %v1792_v1 = vld [vmem:[%s2117_s1 + $0xe4] ss:$16 sps:$4 sm:$0xff]   ;;  %v1797_v2 = vld [vmem:[%s2117_s1 + $0xe0] ss:$16 sps:$4 sm:$0xff]   ;;  %v1755_v3 = vmov 0   ;;  %v160_v38 = vld [vmem:[%s1782_s16 + $0x8] sm:$0xff] }
  0x13   : > { %388 = vmatprep.mubr.bf16.mxu0 %v1755_v3  ;;  %429 = vmatprep.mubr.bf16.mxu1 %v1755_v3  ;;  %v1805_v4 = vld [vmem:[%s2117_s1 + $0xc4] ss:$16 sps:$4 sm:$0xff]   ;;  %v1811_v5 = vld [vmem:[%s2117_s1 + $0xc0] ss:$16 sps:$4 sm:$0xff]   ;;  %v1822_v7 = vld [vmem:[%s2117_s1 + $0xec] ss:$16 sps:$4 sm:$0xff]  }
  0x14   : > { %356 = vmatprep.subr.bf16.mxu0 %v1792_v1  ;;  %v1817_v6 = vld [vmem:[%s2117_s1 + $0xa4] ss:$16 sps:$4 sm:$0xff]   ;;  %v1827_v8 = vld [vmem:[%s2117_s1 + $0xe8] ss:$16 sps:$4 sm:$0xff]   ;;  %v1833_v9 = vld [vmem:[%s2117_s1 + $0xa0] ss:$16 sps:$4 sm:$0xff]   ;;  %397 = vmatprep.subr.bf16.mxu1 %v1822_v7 }
  0x15   : > { %357 = vmatpush1.bf16.msra.mxu0 %v1797_v2  ;;  %v1840_v10 = vld [vmem:[%s2117_s1 + $0x84] ss:$16 sps:$4 sm:$0xff]   ;;  %398 = vmatpush1.bf16.msra.mxu1 %v1827_v8  ;;  %v1846_v11 = vld [vmem:[%s2117_s1 + $0xcc] ss:$16 sps:$4 sm:$0xff]   ;;  %v1851_v12 = vld [vmem:[%s2117_s1 + $0xc8] ss:$16 sps:$4 sm:$0xff]  }
  0x16   : > { %358 = vmatprep.subr.bf16.mxu0 %v1805_v4  ;;  %399 = vmatprep.subr.bf16.mxu1 %v1846_v11  ;;  %v1858_v13 = vld [vmem:[%s2117_s1 + $0x80] ss:$16 sps:$4 sm:$0xff]   ;;  %v1863_v14 = vld [vmem:[%s2117_s1 + $0x64] ss:$16 sps:$4 sm:$0xff]   ;;  %v1868_v15 = vld [vmem:[%s2117_s1 + $0xac] ss:$16 sps:$4 sm:$0xff]  }
  0x17   : > { %v1875_v16 = vld [vmem:[%s2117_s1 + $0xa8] ss:$16 sps:$4 sm:$0xff]   ;;  %v1881_v17 = vld [vmem:[%s2117_s1 + $0x8c] ss:$16 sps:$4 sm:$0xff]   ;;  %v1887_v18 = vld [vmem:[%s2117_s1 + $0x60] ss:$16 sps:$4 sm:$0xff]  }
  0x18   : > { %v1893_v19 = vld [vmem:[%s2117_s1 + $0x44] ss:$16 sps:$4 sm:$0xff]   ;;  %v1899_v20 = vld [vmem:[%s2117_s1 + $0x88] ss:$16 sps:$4 sm:$0xff]   ;;  %v1905_v21 = vld [vmem:[%s2117_s1 + $0x6c] ss:$16 sps:$4 sm:$0xff]  }
  0x19   : > { %359 = vmatpush1.bf16.msra.mxu0 %v1811_v5  ;;  %400 = vmatpush1.bf16.msra.mxu1 %v1851_v12  ;;  %v1910_v22 = vld [vmem:[%s2117_s1 + $0x40] ss:$16 sps:$4 sm:$0xff]   ;;  %v1916_v23 = vld [vmem:[%s2117_s1 + $0x24] ss:$16 sps:$4 sm:$0xff]   ;;  %v1923_v24 = vld [vmem:[%s2117_s1 + $0x68] ss:$16 sps:$4 sm:$0xff]  }
  0x1a   : > { %360 = vmatprep.subr.bf16.mxu0 %v1817_v6  ;;  %401 = vmatprep.subr.bf16.mxu1 %v1868_v15  ;;  %v1929_v25 = vld [vmem:[%s2117_s1 + $0x4c] ss:$16 sps:$4 sm:$0xff]   ;;  %v1935_v26 = vld [vmem:[%s2117_s1 + $0x20] ss:$16 sps:$4 sm:$0xff]   ;;  %v1941_v27 = vld [vmem:[%s2117_s1 + $0x4] ss:$16 sps:$4 sm:$0xff]  }
  0x1b   : > { %v1947_v28 = vld [vmem:[%s2117_s1 + $0x48] ss:$16 sps:$4 sm:$0xff]   ;;  %v1953_v29 = vld [vmem:[%s2117_s1 + $0x2c] ss:$16 sps:$4 sm:$0xff]   ;;  %v1959_v30 = vld [vmem:[%s2117_s1] ss:$16 sps:$4 sm:$0xff]  }
  0x1c   : > { %v157_v31 = vld [vmem:[#allocation2] sm:$0xff]  ;;  %v1966_v32 = vld [vmem:[%s2117_s1 + $0x28] ss:$16 sps:$4 sm:$0xff]   ;;  %v1972_v33 = vld [vmem:[%s2117_s1 + $0xc] ss:$16 sps:$4 sm:$0xff]  }
  0x1d   : > { %361 = vmatpush1.bf16.msra.mxu0 %v1833_v9  ;;  %402 = vmatpush1.bf16.msra.mxu1 %v1875_v16  ;;  %v163_v34 = vpack.c.bf16 %v157_v31, %v157_v31  ;;  %v1979_v35 = vld [vmem:[%s2117_s1 + $0x8] ss:$16 sps:$4 sm:$0xff]   ;;  %v159_v36 = vld [vmem:[%s1782_s16] sm:$0xff]  ;;  %v161_v51 = vld [vmem:[%s1782_s16 + $0x10] sm:$0xff] }
  0x1e   : > { %362 = vmatprep.subr.bf16.mxu0 %v1840_v10  ;;  %403 = vmatprep.subr.bf16.mxu1 %v1881_v17  ;;  %v162_v48 = vld [vmem:[%s1782_s16 + $0x18] sm:$0xff]  ;;  %v158_v62 = vld [vmem:[#allocation3] sm:$0xff] }
  0x21   : > { %363 = vmatpush1.bf16.msra.mxu0 %v1858_v13  ;;  %404 = vmatpush1.bf16.msra.mxu1 %v1899_v20 }
  0x22   : > { %364 = vmatprep.subr.bf16.mxu0 %v1863_v14  ;;  %405 = vmatprep.subr.bf16.mxu1 %v1905_v21 }
  0x25   : > { %365 = vmatpush1.bf16.msra.mxu0 %v1887_v18  ;;  %406 = vmatpush1.bf16.msra.mxu1 %v1923_v24 }
  0x26   : > { %366 = vmatprep.subr.bf16.mxu0 %v1893_v19  ;;  %407 = vmatprep.subr.bf16.mxu1 %v1929_v25 }
  0x29   : > { %367 = vmatpush1.bf16.msra.mxu0 %v1910_v22  ;;  %408 = vmatpush1.bf16.msra.mxu1 %v1947_v28 }
  0x2a   : > { %368 = vmatprep.subr.bf16.mxu0 %v1916_v23  ;;  %409 = vmatprep.subr.bf16.mxu1 %v1953_v29 }
  0x2d   : > { %369 = vmatpush1.bf16.msra.mxu0 %v1935_v26  ;;  %410 = vmatpush1.bf16.msra.mxu1 %v1966_v32 }
  0x2e   : > { %370 = vmatprep.subr.bf16.mxu0 %v1941_v27  ;;  %411 = vmatprep.subr.bf16.mxu1 %v1972_v33 }
  0x31   : > { %371 = vmatpush1.bf16.msra.mxu0 %v1959_v30  ;;  %412 = vmatpush1.bf16.msra.mxu1 %v1979_v35 }
  0x32   : > { %665 = vmatprep.subr.bf16.mxu0 %v1792_v1  ;;  %706 = vmatprep.subr.bf16.mxu1 %v1822_v7 }
  0x34   : > { %389 = vmatmul.mubr.bf16.vlgmr.msra.gmra.mxu0 %v163_v34  ;;  %430 = vmatmul.mubr.bf16.vlgmr.msra.gmra.mxu1 %v163_v34 }
  0x35   : > { %666 = vmatpush1.bf16.msra.mxu0 %v1797_v2  ;;  %697 = vmatprep.mubr.bf16.mxu0 %v1755_v3 }
  0x36   : > { %667 = vmatprep.subr.bf16.mxu0 %v1805_v4  ;;  %707 = vmatpush1.bf16.msra.mxu1 %v1827_v8 }
  0x37   : > { %708 = vmatprep.subr.bf16.mxu1 %v1846_v11  ;;  %738 = vmatprep.mubr.bf16.mxu1 %v1755_v3 }
  0x39   : > { %668 = vmatpush1.bf16.msra.mxu0 %v1811_v5 }
  0x3a   : > { %669 = vmatprep.subr.bf16.mxu0 %v1817_v6  ;;  %709 = vmatpush1.bf16.msra.mxu1 %v1851_v12 }
  0x3b   : > { %710 = vmatprep.subr.bf16.mxu1 %v1868_v15 }
  0x3d   : > { %670 = vmatpush1.bf16.msra.mxu0 %v1833_v9 }
  0x3e   : > { %671 = vmatprep.subr.bf16.mxu0 %v1840_v10  ;;  %711 = vmatpush1.bf16.msra.mxu1 %v1875_v16 }
  0x3f   : > { %712 = vmatprep.subr.bf16.mxu1 %v1881_v17 }
  0x41   : > { %672 = vmatpush1.bf16.msra.mxu0 %v1858_v13 }
  0x42   : > { %673 = vmatprep.subr.bf16.mxu0 %v1863_v14  ;;  %713 = vmatpush1.bf16.msra.mxu1 %v1899_v20 }
  0x43   : > { %714 = vmatprep.subr.bf16.mxu1 %v1905_v21 }
  0x45   : > { %674 = vmatpush1.bf16.msra.mxu0 %v1887_v18 }
  0x46   : > { %675 = vmatprep.subr.bf16.mxu0 %v1893_v19  ;;  %715 = vmatpush1.bf16.msra.mxu1 %v1923_v24 }
  0x47   : > { %716 = vmatprep.subr.bf16.mxu1 %v1929_v25 }
  0x49   : > { %676 = vmatpush1.bf16.msra.mxu0 %v1910_v22 }
  0x4a   : > { %677 = vmatprep.subr.bf16.mxu0 %v1916_v23  ;;  %717 = vmatpush1.bf16.msra.mxu1 %v1947_v28 }
  0x4b   : > { %718 = vmatprep.subr.bf16.mxu1 %v1953_v29 }
  0x4d   : > { %678 = vmatpush1.bf16.msra.mxu0 %v1935_v26 }
  0x4e   : > { %679 = vmatprep.subr.bf16.mxu0 %v1941_v27  ;;  %719 = vmatpush1.bf16.msra.mxu1 %v1966_v32 }
  0x4f   : > { %720 = vmatprep.subr.bf16.mxu1 %v1972_v33 }
  0x51   : > { %680 = vmatpush1.bf16.msra.mxu0 %v1959_v30 }
  0x52   : > { %975 = vmatprep.subr.bf16.mxu0 %v1792_v1  ;;  %721 = vmatpush1.bf16.msra.mxu1 %v1979_v35 }
  0x53   : > { %1016 = vmatprep.subr.bf16.mxu1 %v1822_v7 }
  0xf4   : > { %v390_v37 = vpop.f32.mrf.mxu0  ;;  %v431_v45 = vpop.f32.mrf.mxu1 }
  0xf5   : > { %v438_v39 = vadd.f32 %v390_v37, %v159_v36  ;;  %v440_v53 = vadd.f32 %v431_v45, %v161_v51 }
  0xf6   : > { %v392_v40 = vpop.f32.mrf.mxu0  ;;  %v433_v47 = vpop.f32.mrf.mxu1 }
  0xf7   : > { %v1498_v41 = vmul.f32 -1.442695, %v438_v39  ;;  %v439_v42 = vadd.f32 %v392_v40, %v160_v38  ;;  %v441_v52 = vadd.f32 %v433_v47, %v162_v48 }
  0xf8   : > { %v394_v43 = vpop.f32.mrf.mxu0  ;;  %v435_v49 = vpop.f32.mrf.mxu1 }
  0xf9   : > { %1682 = vpow2.f32 %v1498_v41  ;;  %v1499_v44 = vmul.f32 -1.442695, %v439_v42  ;;  %v1500_v54 = vmul.f32 -1.442695, %v441_v52  ;;  %v1501_v41 = vld [vmem:[%s1782_s16 + $0x20] sm:$0xff] }
  0xfa   : > { %v395_v46 = vpop.f32.mrf.mxu0  ;;  %v436_v50 = vpop.f32.mrf.mxu1 }
  0xfb   : > { %1684 = vpow2.f32 %v1499_v44  ;;  %v1502_v44 = vld [vmem:[%s1782_s16 + $0x28] sm:$0xff] }
  0xfc   : > { %1686 = vtanh.f32 %v440_v53 }
  0xfd   : > { %1688 = vpow2.f32 %v1500_v54 }
 0x106   : > { %v1683_v55 = vpop.eup %1682 }
 0x107   : > { %v445_v56 = vadd.f32 1.0, %v1683_v55  ;;  %v1503_v55 = vld [vmem:[%s1782_s16 + $0x30] sm:$0xff] }
 0x108   : > { %v1685_v57 = vpop.eup %1684 }
 0x109   : > { %1690 = vrcp.f32 %v445_v56  ;;  %v451_v58 = vadd.f32 1.0, %v1685_v57  ;;  %v1687_v59 = vpop.eup %1686 }
 0x10a   : > { %v1689_v60 = vpop.eup %1688 }
 0x10b   : > { %1692 = vrcp.f32 %v451_v58  ;;  %v458_v0 = vadd.f32 1.0, %v1689_v60 }
 0x10d   : > { %1694 = vrcp.f32 %v458_v0 }
 0x116   : > { %v1691_v61 = vpop.eup %1690 }
 0x117   : > { %v462_v34 = vmul.f32 %v1691_v61, %v1687_v59 }
 0x118   : > { %v1693_v63 = vpop.eup %1692 }
 0x119   : > { %v461_v31 = vmul.f32 %v1693_v63, %v158_v62 }
 0x11a   : > { %v1695_v37 = vpop.eup %1694 }
 0x11b   : > { %v2023_v36 = vadd.f32 %v462_v34, %v461_v31 }
 0x11d   : > { %1696 = vtanh.f32 %v2023_v36 }
 0x12a   : > { %v1697_v38 = vpop.eup %1696 }
 0x12b   : > { %v465_v39 = vmul.f32 %v1697_v38, %v1695_v37 }
 0x12d   : > { %466 = vst [vmem:[%s1787_s19] sm:$0xff] %v465_v39  ;;  %v472_v40 = vpack.c.bf16 %v465_v39, %v465_v39 }
 0x12f   : > { %698 = vmatmul.mubr.bf16.vlgmr.msra.gmra.mxu0 %v472_v40  ;;  %739 = vmatmul.mubr.bf16.vlgmr.msra.gmra.mxu1 %v472_v40 }
 0x130   : > { %976 = vmatpush1.bf16.msra.mxu0 %v1797_v2  ;;  %1017 = vmatpush1.bf16.msra.mxu1 %v1827_v8 }
 0x131   : > { %977 = vmatprep.subr.bf16.mxu0 %v1805_v4  ;;  %1018 = vmatprep.subr.bf16.mxu1 %v1846_v11 }
 0x132   : > { %1007 = vmatprep.mubr.bf16.mxu0 %v1755_v3  ;;  %1048 = vmatprep.mubr.bf16.mxu1 %v1755_v3 }
 0x134   : > { %978 = vmatpush1.bf16.msra.mxu0 %v1811_v5  ;;  %1019 = vmatpush1.bf16.msra.mxu1 %v1851_v12 }
 0x135   : > { %979 = vmatprep.subr.bf16.mxu0 %v1817_v6  ;;  %1020 = vmatprep.subr.bf16.mxu1 %v1868_v15 }
 0x138   : > { %980 = vmatpush1.bf16.msra.mxu0 %v1833_v9  ;;  %1021 = vmatpush1.bf16.msra.mxu1 %v1875_v16 }
 0x139   : > { %981 = vmatprep.subr.bf16.mxu0 %v1840_v10  ;;  %1022 = vmatprep.subr.bf16.mxu1 %v1881_v17 }
 0x13c   : > { %982 = vmatpush1.bf16.msra.mxu0 %v1858_v13  ;;  %1023 = vmatpush1.bf16.msra.mxu1 %v1899_v20 }
 0x13d   : > { %983 = vmatprep.subr.bf16.mxu0 %v1863_v14  ;;  %1024 = vmatprep.subr.bf16.mxu1 %v1905_v21 }
 0x140   : > { %984 = vmatpush1.bf16.msra.mxu0 %v1887_v18  ;;  %1025 = vmatpush1.bf16.msra.mxu1 %v1923_v24 }
 0x141   : > { %985 = vmatprep.subr.bf16.mxu0 %v1893_v19  ;;  %1026 = vmatprep.subr.bf16.mxu1 %v1929_v25 }
 0x144   : > { %986 = vmatpush1.bf16.msra.mxu0 %v1910_v22  ;;  %1027 = vmatpush1.bf16.msra.mxu1 %v1947_v28 }
 0x145   : > { %987 = vmatprep.subr.bf16.mxu0 %v1916_v23  ;;  %1028 = vmatprep.subr.bf16.mxu1 %v1953_v29 }
 0x148   : > { %988 = vmatpush1.bf16.msra.mxu0 %v1935_v26  ;;  %1029 = vmatpush1.bf16.msra.mxu1 %v1966_v32 }
 0x149   : > { %989 = vmatprep.subr.bf16.mxu0 %v1941_v27  ;;  %1030 = vmatprep.subr.bf16.mxu1 %v1972_v33 }
 0x14c   : > { %990 = vmatpush1.bf16.msra.mxu0 %v1959_v30  ;;  %1031 = vmatpush1.bf16.msra.mxu1 %v1979_v35 }
 0x14d   : > { %1285 = vmatprep.subr.bf16.mxu0 %v1792_v1  ;;  %1326 = vmatprep.subr.bf16.mxu1 %v1822_v7  ;;  %v1504_v1 = vld [vmem:[%s1782_s16 + $0x38] sm:$0xff] }
 0x1ef   : > { %v699_v42 = vpop.f32.mrf.mxu0  ;;  %v740_v43 = vpop.f32.mrf.mxu1 }
 0x1f0   : > { %v747_v45 = vadd.f32 %v1501_v41, %v699_v42  ;;  %v749_v58 = vadd.f32 %v1503_v55, %v740_v43 }
 0x1f1   : > { %v701_v46 = vpop.f32.mrf.mxu0  ;;  %v742_v47 = vpop.f32.mrf.mxu1 }
 0x1f2   : > { %v1537_v48 = vmul.f32 -1.442695, %v747_v45  ;;  %v748_v49 = vadd.f32 %v1502_v44, %v701_v46  ;;  %v750_v7 = vadd.f32 %v1504_v1, %v742_v47  ;;  %v1581_v47 = vld [vmem:[%s1782_s16 + $0x60] sm:$0xff] }
 0x1f3   : > { %v703_v50 = vpop.f32.mrf.mxu0  ;;  %v744_v51 = vpop.f32.mrf.mxu1 }
 0x1f4   : > { %1698 = vpow2.f32 %v1537_v48  ;;  %v1538_v52 = vmul.f32 -1.442695, %v748_v49  ;;  %v1539_v56 = vmul.f32 -1.442695, %v750_v7  ;;  %v1582_v50 = vld [vmem:[%s1782_s16 + $0x68] sm:$0xff] }
 0x1f5   : > { %v704_v53 = vpop.f32.mrf.mxu0  ;;  %v745_v54 = vpop.f32.mrf.mxu1 }
 0x1f6   : > { %1700 = vpow2.f32 %v1538_v52 }
 0x1f7   : > { %1702 = vpow2.f32 %v1539_v56 }
 0x201   : > { %v1699_v57 = vpop.eup %1698 }
 0x202   : > { %v754_v59 = vadd.f32 1.0, %v1699_v57 }
 0x203   : > { %v1701_v60 = vpop.eup %1700 }
 0x204   : > { %1704 = vrcp.f32 %v754_v59  ;;  %v760_v61 = vadd.f32 1.0, %v1701_v60  ;;  %v1703_v62 = vpop.eup %1702  ;;  %v1584_v59 = vld [vmem:[%s1782_s16 + $0x78] sm:$0xff] }
 0x205   : > { %1706 = vtanh.f32 %v749_v58  ;;  %v767_v34 = vadd.f32 1.0, %v1703_v62 }
 0x206   : > { %1708 = vrcp.f32 %v760_v61  ;;  %v1583_v61 = vld [vmem:[%s1782_s16 + $0x70] sm:$0xff] }
 0x207   : > { %1710 = vrcp.f32 %v767_v34 }
 0x211   : > { %v1705_v63 = vpop.eup %1704 }
 0x212   : > { %v1707_v0 = vpop.eup %1706 }
 0x213   : > { %v1709_v31 = vpop.eup %1708  ;;  %v771_v37 = vmul.f32 %v1707_v0, %v1705_v63 }
 0x214   : > { %v770_v38 = vmul.f32 %v1709_v31, %v2023_v36  ;;  %v1711_v40 = vpop.eup %1710 }
 0x216   : > { %v2066_v39 = vadd.f32 %v771_v37, %v770_v38 }
 0x218   : > { %1712 = vtanh.f32 %v2066_v39 }
 0x225   : > { %v1713_v41 = vpop.eup %1712 }
 0x226   : > { %v774_v42 = vmul.f32 %v1713_v41, %v1711_v40 }
 0x228   : > { %1540 = vst [vmem:[%s1787_s19 + $0x8] sm:$0xff] %v774_v42  ;;  %v782_v43 = vpack.c.bf16 %v774_v42, %v774_v42 }
 0x22a   : > { %1008 = vmatmul.mubr.bf16.vlgmr.msra.gmra.mxu0 %v782_v43  ;;  %1049 = vmatmul.mubr.bf16.vlgmr.msra.gmra.mxu1 %v782_v43 }
 0x22b   : > { %1286 = vmatpush1.bf16.msra.mxu0 %v1797_v2  ;;  %1327 = vmatpush1.bf16.msra.mxu1 %v1827_v8  ;;  %v1541_v2 = vld [vmem:[%s1782_s16 + $0x40] sm:$0xff] }
 0x22c   : > { %1287 = vmatprep.subr.bf16.mxu0 %v1805_v4  ;;  %1328 = vmatprep.subr.bf16.mxu1 %v1846_v11 }
 0x22d   : > { %1317 = vmatprep.mubr.bf16.mxu0 %v1755_v3  ;;  %1358 = vmatprep.mubr.bf16.mxu1 %v1755_v3 }
 0x22f   : > { %1288 = vmatpush1.bf16.msra.mxu0 %v1811_v5  ;;  %1329 = vmatpush1.bf16.msra.mxu1 %v1851_v12  ;;  %v1542_v5 = vld [vmem:[%s1782_s16 + $0x48] sm:$0xff] }
 0x230   : > { %1289 = vmatprep.subr.bf16.mxu0 %v1817_v6  ;;  %1330 = vmatprep.subr.bf16.mxu1 %v1868_v15 }
 0x233   : > { %1290 = vmatpush1.bf16.msra.mxu0 %v1833_v9  ;;  %1331 = vmatpush1.bf16.msra.mxu1 %v1875_v16 }
 0x234   : > { %1291 = vmatprep.subr.bf16.mxu0 %v1840_v10  ;;  %1332 = vmatprep.subr.bf16.mxu1 %v1881_v17  ;;  %v1544_v17 = vld [vmem:[%s1782_s16 + $0x58] sm:$0xff] }
 0x237   : > { %1292 = vmatpush1.bf16.msra.mxu0 %v1858_v13  ;;  %1333 = vmatpush1.bf16.msra.mxu1 %v1899_v20 }
 0x238   : > { %1293 = vmatprep.subr.bf16.mxu0 %v1863_v14  ;;  %1334 = vmatprep.subr.bf16.mxu1 %v1905_v21 }
 0x23b   : > { %1294 = vmatpush1.bf16.msra.mxu0 %v1887_v18  ;;  %1335 = vmatpush1.bf16.msra.mxu1 %v1923_v24 }
 0x23c   : > { %1295 = vmatprep.subr.bf16.mxu0 %v1893_v19  ;;  %1336 = vmatprep.subr.bf16.mxu1 %v1929_v25  ;;  %v1543_v19 = vld [vmem:[%s1782_s16 + $0x50] sm:$0xff] }
 0x23f   : > { %1296 = vmatpush1.bf16.msra.mxu0 %v1910_v22  ;;  %1337 = vmatpush1.bf16.msra.mxu1 %v1947_v28 }
 0x240   : > { %1297 = vmatprep.subr.bf16.mxu0 %v1916_v23  ;;  %1338 = vmatprep.subr.bf16.mxu1 %v1953_v29 }
 0x243   : > { %1298 = vmatpush1.bf16.msra.mxu0 %v1935_v26  ;;  %1339 = vmatpush1.bf16.msra.mxu1 %v1966_v32 }
 0x244   : > { %1299 = vmatprep.subr.bf16.mxu0 %v1941_v27  ;;  %1340 = vmatprep.subr.bf16.mxu1 %v1972_v33 }
 0x247   : > { %1300 = vmatpush1.bf16.msra.mxu0 %v1959_v30  ;;  %1341 = vmatpush1.bf16.msra.mxu1 %v1979_v35 }
 0x2ea   : > { %v1009_v3 = vpop.f32.mrf.mxu0  ;;  %v1050_v4 = vpop.f32.mrf.mxu1 }
 0x2eb   : > { %v1057_v6 = vadd.f32 %v1541_v2, %v1009_v3  ;;  %v1059_v22 = vadd.f32 %v1543_v19, %v1050_v4 }
 0x2ec   : > { %v1011_v8 = vpop.f32.mrf.mxu0  ;;  %v1052_v9 = vpop.f32.mrf.mxu1 }
 0x2ed   : > { %v1577_v10 = vmul.f32 -1.442695, %v1057_v6  ;;  %v1058_v11 = vadd.f32 %v1542_v5, %v1011_v8  ;;  %v1060_v18 = vadd.f32 %v1544_v17, %v1052_v9 }
 0x2ee   : > { %v1013_v12 = vpop.f32.mrf.mxu0  ;;  %v1054_v13 = vpop.f32.mrf.mxu1 }
 0x2ef   : > { %1714 = vpow2.f32 %v1577_v10  ;;  %v1578_v14 = vmul.f32 -1.442695, %v1058_v11  ;;  %v1579_v20 = vmul.f32 -1.442695, %v1060_v18 }
 0x2f0   : > { %v1014_v15 = vpop.f32.mrf.mxu0  ;;  %v1055_v16 = vpop.f32.mrf.mxu1 }
 0x2f1   : > { %1716 = vpow2.f32 %v1578_v14 }
 0x2f2   : > { %1718 = vpow2.f32 %v1579_v20 }
 0x2fc   : > { %v1715_v21 = vpop.eup %1714 }
 0x2fd   : > { %v1064_v23 = vadd.f32 1.0, %v1715_v21 }
 0x2fe   : > { %v1717_v24 = vpop.eup %1716 }
 0x2ff   : > { %1720 = vrcp.f32 %v1064_v23  ;;  %v1070_v25 = vadd.f32 1.0, %v1717_v24  ;;  %v1719_v26 = vpop.eup %1718 }
 0x300   : > { %1722 = vtanh.f32 %v1059_v22  ;;  %v1077_v30 = vadd.f32 1.0, %v1719_v26 }
 0x301   : > { %1724 = vrcp.f32 %v1070_v25 }
 0x302   : > { %1726 = vrcp.f32 %v1077_v30 }
 0x30c   : > { %v1721_v27 = vpop.eup %1720 }
 0x30d   : > { %v1723_v28 = vpop.eup %1722 }
 0x30e   : > { %v1725_v29 = vpop.eup %1724  ;;  %v1081_v32 = vmul.f32 %v1723_v28, %v1721_v27 }
 0x30f   : > { %v1080_v33 = vmul.f32 %v1725_v29, %v2066_v39  ;;  %v1727_v36 = vpop.eup %1726 }
 0x311   : > { %v1082_v35 = vadd.f32 %v1081_v32, %v1080_v33 }
 0x313   : > { %1728 = vtanh.f32 %v1082_v35 }
 0x320   : > { %v1729_v44 = vpop.eup %1728 }
 0x321   : > { %v1084_v45 = vmul.f32 %v1729_v44, %v1727_v36 }
 0x323   : > { %1580 = vst [vmem:[%s1787_s19 + $0x10] sm:$0xff] %v1084_v45  ;;  %v1092_v46 = vpack.c.bf16 %v1084_v45, %v1084_v45 }
 0x325   : > { %1318 = vmatmul.mubr.bf16.vlgmr.msra.gmra.mxu0 %v1092_v46  ;;  %1359 = vmatmul.mubr.bf16.vlgmr.msra.gmra.mxu1 %v1092_v46 }
 0x3e5   : > { %v1319_v48 = vpop.f32.mrf.mxu0  ;;  %v1360_v49 = vpop.f32.mrf.mxu1 }
 0x3e6   : > { %v1367_v51 = vadd.f32 %v1581_v47, %v1319_v48  ;;  %v1369_v0 = vadd.f32 %v1583_v61, %v1360_v49 }
 0x3e7   : > { %v1321_v52 = vpop.f32.mrf.mxu0  ;;  %v1362_v53 = vpop.f32.mrf.mxu1 }
 0x3e8   : > { %v1617_v54 = vmul.f32 -1.442695, %v1367_v51  ;;  %v1368_v1 = vadd.f32 %v1582_v50, %v1321_v52  ;;  %v1370_v60 = vadd.f32 %v1584_v59, %v1362_v53 }
 0x3e9   : > { %v1323_v7 = vpop.f32.mrf.mxu0  ;;  %v1364_v55 = vpop.f32.mrf.mxu1 }
 0x3ea   : > { %1730 = vpow2.f32 %v1617_v54  ;;  %v1618_v56 = vmul.f32 -1.442695, %v1368_v1  ;;  %v1619_v62 = vmul.f32 -1.442695, %v1370_v60 }
 0x3eb   : > { %v1324_v57 = vpop.f32.mrf.mxu0  ;;  %v1365_v58 = vpop.f32.mrf.mxu1 }
 0x3ec   : > { %1732 = vpow2.f32 %v1618_v56 }
 0x3ed   : > { %1734 = vpow2.f32 %v1619_v62 }
 0x3f7   : > { %v1731_v63 = vpop.eup %1730 }
 0x3f8   : > { %v1374_v31 = vadd.f32 1.0, %v1731_v63 }
 0x3f9   : > { %v1733_v34 = vpop.eup %1732 }
 0x3fa   : > { %1736 = vrcp.f32 %v1374_v31  ;;  %v1380_v37 = vadd.f32 1.0, %v1733_v34  ;;  %v1735_v38 = vpop.eup %1734 }
 0x3fb   : > { %1738 = vtanh.f32 %v1369_v0  ;;  %v1387_v42 = vadd.f32 1.0, %v1735_v38 }
 0x3fc   : > { %1740 = vrcp.f32 %v1380_v37 }
 0x3fd   : > { %1742 = vrcp.f32 %v1387_v42 }
 0x407   : > { %v1737_v39 = vpop.eup %1736 }
 0x408   : > { %v1739_v40 = vpop.eup %1738 }
 0x409   : > { %v1741_v41 = vpop.eup %1740  ;;  %v1391_v43 = vmul.f32 %v1739_v40, %v1737_v39 }
 0x40a   : > { %v1390_v2 = vmul.f32 %v1741_v41, %v1082_v35  ;;  %v1743_v4 = vpop.eup %1742 }
 0x40c   : > { %v1392_v3 = vadd.f32 %v1391_v43, %v1390_v2 }
 0x40e   : > { %1744 = vtanh.f32 %v1392_v3  ;;  %1398 = vst [vmem:[#allocation3] sm:$0xff] %v1392_v3 }
 0x41b   : > { %v1745_v5 = vpop.eup %1744 }
 0x41c   : > { %v1394_v6 = vmul.f32 %v1745_v5, %v1743_v4 }
 0x41e   : > { %1620 = vst [vmem:[%s1787_s19 + $0x18] sm:$0xff] %v1394_v6  ;;  %1397 = vst [vmem:[#allocation2] sm:$0xff] %v1394_v6 }
 0x41f PF: > { %s12_s9 = sadd.s32 1, %s1752_s9  }
 0x420   : > { %p9_p5 = scmp.ge.s32.totalorder %s12_s9, 4  }
 0x422   :  { %11 = sbr.rel (!%p9_p5) target bundleno = 1 (0x1), region = 68 }

</bundles_post_ra>
